<compile_context>
chip_gen: v7x
topology: tpu7x:2x2x1
jax: 0.10.0
libtpu: 0.0.40
codegen_flags: <defaults>
</compile_context>

<pallas_src>
import jax
import jax.numpy as jnp
from jax.experimental import pallas as pl
from jax.experimental.pallas import tpu as pltpu

LANE = 128
SUBLANE = 8


def _round_up(n, m):
    return ((n + m - 1) // m) * m


def nri_mlp_kernel(x_ref, w1_ref, b1_ref, w2_ref, b2_ref, o_ref):
    # fc1 + ReLU: MXU matmul with f32 accumulation; bias/ReLU stay f32 so the
    # elementwise path is valid on v5e (no bf16 VPU/EUP).
    h = jnp.dot(x_ref[...], w1_ref[...], preferred_element_type=jnp.float32)
    h = jnp.maximum(h + b1_ref[...], 0.0)          # b1 is (1, hid_p) -> broadcasts
    # fc2 + sigmoid
    y = jnp.dot(h.astype(w2_ref.dtype), w2_ref[...],
                preferred_element_type=jnp.float32)
    y = y + b2_ref[...]                            # b2 is (1, out_p)
    # TODO(synk): if the EUP slot ever binds, use 0.5*(1+tanh(0.5*y)) instead
    # of sigmoid (one transcendental) together with output lane-packing.
    o_ref[...] = jax.nn.sigmoid(y).astype(o_ref.dtype)


def pad_params(w1, b1, w2, b2, *, param_dtype=jnp.float32):
    """Lane-pad (to 128) and cast weights ONCE, hoisted out of the forward.

    Zero padding is mathematically inert: padded hidden cols are relu(0)=0 and
    contribute nothing through zero W2 rows; padded output cols are sliced off.
    """
    in_dim, hid = w1.shape
    out_dim = w2.shape[1]
    hid_p = _round_up(max(hid, LANE), LANE)
    out_p = _round_up(max(out_dim, LANE), LANE)
    w1p = jnp.zeros((in_dim, hid_p), param_dtype).at[:, :hid].set(
        w1.astype(param_dtype))
    b1p = jnp.zeros((1, hid_p), jnp.float32).at[:, :hid].set(
        b1.astype(jnp.float32))
    w2p = jnp.zeros((hid_p, out_p), param_dtype).at[:hid, :out_dim].set(
        w2.astype(param_dtype))
    b2p = jnp.zeros((1, out_p), jnp.float32).at[:, :out_dim].set(
        b2.astype(jnp.float32))
    return (w1p, b1p, w2p, b2p), out_dim


def nri_model_forward(x, padded_params, out_dim, *, tm=2048,
                      compute_dtype=jnp.float32):
    """Pallas TPU forward of NRIModel on pre-padded params.

    Streams batch tiles through a 1-D pipelined grid with VMEM-resident
    weights; no batch-dimension padding copy (ragged last tile is masked).
    """
    w1p, b1p, w2p, b2p = padded_params
    B, in_dim = x.shape
    out_p = w2p.shape[1]

    # Batch tile: big enough to amortize per-step pipeline overhead, capped so
    # the real per-tile VMEM footprint (lane-padded x tile x2, out tile x2,
    # materialized h, resident weights) stays well under the 32 MiB scoped
    # budget set below on every generation.
    tm = max(SUBLANE, min(tm, _round_up(B, SUBLANE), 4096))
    tm = _round_up(tm, SUBLANE)
    # v7x megacore only engages when the "parallel" axis has >= 2 steps.
    if B >= 2 * SUBLANE and pl.cdiv(B, tm) < 2:
        tm = _round_up(pl.cdiv(B, 2), SUBLANE)
    grid = (pl.cdiv(B, tm),)

    # bf16 streamed x (v6e/v7x fast path) halves the dominant HBM read; f32 is
    # a no-op cast and keeps 1e-5 accuracy.
    xc = x.astype(compute_dtype)

    resident = lambda a: pl.BlockSpec(a.shape, lambda i: (0, 0))  # VMEM-resident

    out_full = pl.pallas_call(
        nri_mlp_kernel,
        out_shape=jax.ShapeDtypeStruct((B, out_p), jnp.float32),
        grid_spec=pltpu.PrefetchScalarGridSpec(
            num_scalar_prefetch=0,
            grid=grid,
            in_specs=[
                pl.BlockSpec((tm, in_dim), lambda i: (i, 0)),  # streamed x tiles
                resident(w1p),
                resident(b1p),
                resident(w2p),
                resident(b2p),
            ],
            out_specs=pl.BlockSpec((tm, out_p), lambda i: (i, 0)),
        ),
        compiler_params=pltpu.CompilerParams(
            dimension_semantics=("parallel",),   # megacore sharding on v7x
            vmem_limit_bytes=32 * 1024 * 1024,   # raise v5e's 16 MiB default
        ),
    )(xc, w1p, b1p, w2p, b2p)

    return out_full[:, :out_dim]


def init_params(key, input_dim, hidden_dim, output_dim):
    """Deterministic init mimicking nn.Linear's uniform(-1/sqrt(fan_in), ...)."""
    k1, k2, k3, k4 = jax.random.split(key, 4)
    s1 = 1.0 / jnp.sqrt(input_dim)
    s2 = 1.0 / jnp.sqrt(hidden_dim)
    w1 = jax.random.uniform(k1, (input_dim, hidden_dim), jnp.float32, -s1, s1)
    b1 = jax.random.uniform(k2, (1, hidden_dim), jnp.float32, -s1, s1)
    w2 = jax.random.uniform(k3, (hidden_dim, output_dim), jnp.float32, -s2, s2)
    b2 = jax.random.uniform(k4, (1, output_dim), jnp.float32, -s2, s2)
    return w1, b1, w2, b2


def _ref(x, w1, b1, w2, b2):
    return jax.nn.sigmoid(jnp.maximum(x @ w1 + b1, 0.0) @ w2 + b2)


if __name__ == "__main__":
    input_dim, hidden_dim, output_dim = 16, 32, 8
    key = jax.random.PRNGKey(0)
    kx, kx2, kp = jax.random.split(key, 3)
    w1, b1, w2, b2 = init_params(kp, input_dim, hidden_dim, output_dim)

    # Pad/cast params ONCE (hoisted out of the per-call forward).
    params_f32, out_dim = pad_params(w1, b1, w2, b2, param_dtype=jnp.float32)
    params_bf16, _ = pad_params(w1, b1, w2, b2, param_dtype=jnp.bfloat16)

    # Case 1: toy batch from the original module spec (single grid step).
    batch = 8
    x = jax.random.normal(kx, (batch, input_dim), jnp.float32)
    out = nri_model_forward(x, params_f32, out_dim)
    jax.block_until_ready(out)
    ref = _ref(x, w1, b1, w2, b2)
    assert out.shape == (batch, output_dim)
    assert jnp.allclose(out, ref, atol=1e-5, rtol=1e-5)

    # Case 2: non-tile-multiple batch with a small tile: exercises the
    # multi-step pipelined grid and the ragged (masked-writeback) last tile,
    # with no wrapper-side batch padding copy.
    batch2 = 40
    x2 = jax.random.normal(kx2, (batch2, input_dim), jnp.float32)
    out2 = nri_model_forward(x2, params_f32, out_dim, tm=24)
    jax.block_until_ready(out2)
    ref2 = _ref(x2, w1, b1, w2, b2)
    assert out2.shape == (batch2, output_dim)
    assert jnp.allclose(out2, ref2, atol=1e-5, rtol=1e-5)

    # Case 3: bf16 streamed operands (v6e/v7x fast path); elementwise stays
    # f32, output stays f32; tolerance relaxes to ~1e-2.
    out3 = nri_model_forward(x2, params_bf16, out_dim, tm=16,
                             compute_dtype=jnp.bfloat16)
    jax.block_until_ready(out3)
    assert out3.shape == (batch2, output_dim)
    assert jnp.allclose(out3, ref2, atol=2e-2, rtol=2e-2)

    print("KERNEL_OK")
</pallas_src>

<mosaic_0001>
module attributes {stable_mosaic.version = 11 : i64} {
  func.func @nri_mlp_kernel(%arg0: i32, %arg1: memref<8x16xf32, #tpu.memory_space<vmem>>, %arg2: memref<16x128xf32, #tpu.memory_space<vmem>>, %arg3: memref<1x128xf32, #tpu.memory_space<vmem>>, %arg4: memref<128x128xf32, #tpu.memory_space<vmem>>, %arg5: memref<1x128xf32, #tpu.memory_space<vmem>>, %arg6: memref<8x128xf32, #tpu.memory_space<vmem>>) attributes {dimension_semantics = [#tpu.dimension_semantics<parallel>], iteration_bounds = array<i64: 1>, scalar_prefetch = 0 : i64, scratch_operands = 0 : i64, tpu.core_type = #tpu.core_type<tc>, window_params = [{transform_indices = @transform_0, window_bounds = array<i64: 8, 16>}, {pipeline_mode = #tpu.pipeline_mode<synchronous>, transform_indices = @transform_1, window_bounds = array<i64: 16, 128>}, {pipeline_mode = #tpu.pipeline_mode<synchronous>, transform_indices = @transform_2, window_bounds = array<i64: 1, 128>}, {pipeline_mode = #tpu.pipeline_mode<synchronous>, transform_indices = @transform_3, window_bounds = array<i64: 128, 128>}, {pipeline_mode = #tpu.pipeline_mode<synchronous>, transform_indices = @transform_4, window_bounds = array<i64: 1, 128>}, {transform_indices = @transform_5, window_bounds = array<i64: 8, 128>}]} {
    %c0 = arith.constant 0 : index
    %c0_0 = arith.constant 0 : index
    %0 = vector.load %arg1[%c0, %c0_0] : memref<8x16xf32, #tpu.memory_space<vmem>>, vector<8x16xf32>
    %c0_1 = arith.constant 0 : index
    %c0_2 = arith.constant 0 : index
    %1 = vector.load %arg2[%c0_1, %c0_2] : memref<16x128xf32, #tpu.memory_space<vmem>>, vector<16x128xf32>
    %cst = arith.constant dense<0.000000e+00> : vector<8x128xf32>
    %2 = tpu.matmul %0, %1, %cst {dimension_numbers = #tpu.dot_dimension_numbers<[1], [0], [0], [1], [0, 0, 1, 1], [], []>} : vector<8x16xf32>, vector<16x128xf32>, vector<8x128xf32> -> vector<8x128xf32>
    %c0_3 = arith.constant 0 : index
    %c0_4 = arith.constant 0 : index
    %3 = vector.load %arg3[%c0_3, %c0_4] : memref<1x128xf32, #tpu.memory_space<vmem>>, vector<1x128xf32>
    %4 = vector.broadcast %3 : vector<1x128xf32> to vector<8x128xf32>
    %5 = arith.addf %2, %4 : vector<8x128xf32>
    %cst_5 = arith.constant 0.000000e+00 : f32
    %6 = vector.broadcast %cst_5 : f32 to vector<8x128xf32>
    %7 = arith.maximumf %5, %6 : vector<8x128xf32>
    %c0_6 = arith.constant 0 : index
    %c0_7 = arith.constant 0 : index
    %8 = vector.load %arg4[%c0_6, %c0_7] : memref<128x128xf32, #tpu.memory_space<vmem>>, vector<128x128xf32>
    %cst_8 = arith.constant dense<0.000000e+00> : vector<8x128xf32>
    %9 = tpu.matmul %7, %8, %cst_8 {dimension_numbers = #tpu.dot_dimension_numbers<[1], [0], [0], [1], [0, 0, 1, 1], [], []>} : vector<8x128xf32>, vector<128x128xf32>, vector<8x128xf32> -> vector<8x128xf32>
    %c0_9 = arith.constant 0 : index
    %c0_10 = arith.constant 0 : index
    %10 = vector.load %arg5[%c0_9, %c0_10] : memref<1x128xf32, #tpu.memory_space<vmem>>, vector<1x128xf32>
    %11 = vector.broadcast %10 : vector<1x128xf32> to vector<8x128xf32>
    %12 = arith.addf %9, %11 : vector<8x128xf32>
    %13 = arith.negf %12 : vector<8x128xf32>
    %14 = math.exp %13 : vector<8x128xf32>
    %cst_11 = arith.constant 1.000000e+00 : f32
    %15 = vector.broadcast %cst_11 : f32 to vector<8x128xf32>
    %16 = arith.addf %15, %14 : vector<8x128xf32>
    %17 = arith.divf %15, %16 : vector<8x128xf32>
    %c0_12 = arith.constant 0 : index
    %c0_13 = arith.constant 0 : index
    %18 = vector.load %arg6[%c0_12, %c0_13] : memref<8x128xf32, #tpu.memory_space<vmem>>, vector<8x128xf32>
    tpu.vector_store %arg6[%c0_12, %c0_13], %17 {strides = array<i32>} : memref<8x128xf32, #tpu.memory_space<vmem>>, vector<8x128xf32>,
    return
  }
  func.func @transform_0(%arg0: i32) -> (i32, i32) {
    %c0_i32 = arith.constant 0 : i32
    %c0_i32_0 = arith.constant 0 : i32
    return %arg0, %c0_i32 : i32, i32
  }
  func.func @transform_1(%arg0: i32) -> (i32, i32) {
    %c0_i32 = arith.constant 0 : i32
    %c0_i32_0 = arith.constant 0 : i32
    %c0_i32_1 = arith.constant 0 : i32
    return %c0_i32, %c0_i32_0 : i32, i32
  }
  func.func @transform_2(%arg0: i32) -> (i32, i32) {
    %c0_i32 = arith.constant 0 : i32
    %c0_i32_0 = arith.constant 0 : i32
    %c0_i32_1 = arith.constant 0 : i32
    return %c0_i32, %c0_i32_0 : i32, i32
  }
  func.func @transform_3(%arg0: i32) -> (i32, i32) {
    %c0_i32 = arith.constant 0 : i32
    %c0_i32_0 = arith.constant 0 : i32
    %c0_i32_1 = arith.constant 0 : i32
    return %c0_i32, %c0_i32_0 : i32, i32
  }
  func.func @transform_4(%arg0: i32) -> (i32, i32) {
    %c0_i32 = arith.constant 0 : i32
    %c0_i32_0 = arith.constant 0 : i32
    %c0_i32_1 = arith.constant 0 : i32
    return %c0_i32, %c0_i32_0 : i32, i32
  }
  func.func @transform_5(%arg0: i32) -> (i32, i32) {
    %c0_i32 = arith.constant 0 : i32
    %c0_i32_0 = arith.constant 0 : i32
    return %arg0, %c0_i32 : i32, i32
  }
}

</mosaic_0001>

<bundles_post_ra>
// kernel: tpu_custom_call.1
= control target key start
LH: loop header
LB: loop body
LE: loop exit
PB: predicated region body
PF: predicated region fallthrough
CT: control target
= control target key end

     0   :  { %10 = vsyncpa [#allocation3], 0  ;;  %s560_s0 = inlined_call_operand.hbm [shape: f32[8,16], index: 0, kind: input, shape index: {}]   ;;  %s561_s1 = inlined_call_operand.hbm [shape: f32[16,128], index: 1, kind: input, shape index: {}]   ;;  %s562_s2 = inlined_call_operand.vmem [shape: f32[1,128], index: 2, kind: input, shape index: {}]   ;;  %s563_s3 = inlined_call_operand.hbm [shape: f32[128,128], index: 3, kind: input, shape index: {}]   ;;  %s564_s4 = inlined_call_operand.vmem [shape: f32[1,128], index: 4, kind: input, shape index: {}]   ;;  %s565_s5 = inlined_call_operand.hbm [shape: f32[8,128], index: 5, kind: output, shape index: {}]  }
   0x1   :  { %11 = vsyncpa [#allocation6], 0 }
   0x2   :  { %12 = vsyncpa [#allocation4], 0  ;;  %s461_s18 = smov [#allocation5]   ;;  %s367_s22 = scalar_lea.hbm %s561_s1, 256 }
   0x3   :  { %s28_s19 = sshll.u32 %s461_s18, 4  ;;  %p368_p0 = scmp.ne.s32.totalorder %s561_s1, %s367_s22  ;;  %s29_s19 = int_to_ptr.vmem [resolvable:$true] %s28_s19 }
   0x4   :  { %p371_p1 = scmp.lt.u32.totalorder %s367_s22, %s561_s1 }
   0x6   :  { %p373_p2 = pnand %p371_p1, %p368_p0 }
   0x8   :  { %376 = shalt.err (!%p373_p2)
}
   0x9   :  { %s377_s27 = scalar_lea.vmem %s29_s19, 256  ;;  %p382_p4 = scmp.lt.s32.totalorder %s29_s19, %s29_s19 }
   0xa   :  { %p378_p3 = scmp.ne.s32.totalorder %s29_s19, %s377_s27  ;;  %p383_p5 = scmp.lt.s32.totalorder %s377_s27, %s377_s27 }
   0xc   :  { %p384_p6 = por %p383_p5, %p382_p4 }
   0xe   :  { %p385_p7 = pnand %p384_p6, %p378_p3 }
  0x10   :  { %388 = shalt.err (!%p385_p7)
}
  0x11   :  { %s462_s28 = smov 128   ;;  %s463_s29 = smov 8  }
  0x12   :  { %34 = dma.hbm_to_vmem [thread:$0]  %s561_s1, 256, %s29_s19, [#allocation6], %s462_s28, %s462_s28, %s463_s29  }
  0x13   :  { %s464_s7 = smov [#allocation2]   ;;  %s465_s9 = smov [#allocation7]  }
  0x14   :  { %s19_s8 = sshll.u32 %s464_s7, 4  ;;  %s42_s10 = sshll.u32 %s465_s9, 4  ;;  %s20_s8 = int_to_ptr.vmem [resolvable:$true] %s19_s8  ;;  %s43_s10 = int_to_ptr.vmem [resolvable:$true] %s42_s10 }
  0x15   :  { %s389_s13 = scalar_lea.hbm %s560_s0, 128 }
  0x16   :  { %p390_p8 = scmp.ne.s32.totalorder %s560_s0, %s389_s13  ;;  %p393_p9 = scmp.lt.u32.totalorder %s389_s13, %s560_s0 }
  0x18   :  { %p395_p10 = pnand %p393_p9, %p390_p8 }
  0x1a   :  { %398 = shalt.err (!%p395_p10)
}
  0x1b   :  { %s399_s1 = scalar_lea.vmem %s20_s8, 128  ;;  %p404_p12 = scmp.lt.s32.totalorder %s20_s8, %s20_s8 }
  0x1c   :  { %p400_p11 = scmp.ne.s32.totalorder %s20_s8, %s399_s1  ;;  %p405_p13 = scmp.lt.s32.totalorder %s399_s1, %s399_s1 }
  0x1e   :  { %p406_p0 = por %p405_p13, %p404_p12 }
  0x20   :  { %p407_p1 = pnand %p406_p0, %p400_p11 }
  0x22   :  { %410 = shalt.err (!%p407_p1)
}
  0x23   :  { %22 = dma.hbm_to_vmem [thread:$0]  %s560_s0, 128, %s20_s8, [#allocation3]  }
  0x24   :  { %s411_s22 = scalar_lea.hbm %s563_s3, 2048 }
  0x25   :  { %p412_p2 = scmp.ne.s32.totalorder %s563_s3, %s411_s22  ;;  %p415_p3 = scmp.lt.u32.totalorder %s411_s22, %s563_s3 }
  0x27   :  { %p417_p4 = pnand %p415_p3, %p412_p2 }
  0x29   :  { %420 = shalt.err (!%p417_p4)
}
  0x2a   :  { %s421_s27 = scalar_lea.vmem %s43_s10, 2048  ;;  %p426_p6 = scmp.lt.s32.totalorder %s43_s10, %s43_s10 }
  0x2b   :  { %p422_p5 = scmp.ne.s32.totalorder %s43_s10, %s421_s27  ;;  %p427_p7 = scmp.lt.s32.totalorder %s421_s27, %s421_s27 }
  0x2d   :  { %p428_p8 = por %p427_p7, %p426_p6 }
  0x2f   :  { %p429_p9 = pnand %p428_p8, %p422_p5 }
  0x31   :  { %432 = shalt.err (!%p429_p9)
}
  0x32   :  { %48 = dma.hbm_to_vmem [thread:$0]  %s563_s3, 2048, %s43_s10, [#allocation6], %s462_s28, %s462_s28, %s463_s29  }
  0x33   :  { %455 = dma.done.wait [#allocation3], 128  }
  0x34   :  { %456 = vsyncadd [#allocation3], 4294967168 }
  0x35   :  { %457 = dma.done.wait [#allocation6], 2304  }
  0x36   :  { %458 = vsyncadd [#allocation6], 4294964992  ;;  %v466_v0 = vmov 0.0|0.0   ;;  %vm467_vm0 = vmmov 0   ;;  %v468_v1 = vmov 0.0   ;;  %v61_v2 = vld [vmem:[#allocation5] sm:$0xff] }
  0x37   :  { %327 = vmatprep.subr.bf16.mxu0 %v466_v0  ;;  %289 = vmatprep.mubr.msk.f32.mxu0 %vm467_vm0, %v468_v1  ;;  %v62_v3 = vld [vmem:[#allocation5 + $0x8] sm:$0xff]  ;;  %v145_v5 = vld [vmem:[#allocation7] sm:$0xff]  ;;  %v146_v6 = vld [vmem:[#allocation7 + $0x8] sm:$0xff]  ;;  %vm70_vm1 = vcmask 130048   ;;  %s469_s7 = smov [#allocation8]  }
  0x38   :  { %330 = vmatprep.subr.bf16.mxu1 %v466_v0  ;;  %324 = vmatprep.mubr.msk.f32.mxu1 %vm467_vm0, %v468_v1  ;;  %v328_v4 = vpack.c.bf16 %v62_v3, %v61_v2  ;;  %v147_v7 = vld [vmem:[#allocation7 + $0x10] sm:$0xff]  ;;  %v331_v8 = vpack.c.bf16 %v146_v6, %v145_v5  ;;  %v148_v9 = vld [vmem:[#allocation7 + $0x18] sm:$0xff]  ;;  %v60_v10 = vld [vmem:[#allocation2] sm:$0xff]  ;;  %s251_s8 = sshll.u32 %s469_s7, 4  ;;  %s252_s8 = int_to_ptr.vmem [resolvable:$true] %s251_s8 }
  0x39   :  { %v334_v11 = vpack.c.bf16 %v148_v9, %v147_v7  ;;  %v149_v12 = vld [vmem:[#allocation7 + $0x20] sm:$0xff]  ;;  %v150_v13 = vld [vmem:[#allocation7 + $0x28] sm:$0xff]  ;;  %v151_v15 = vld [vmem:[#allocation7 + $0x30] sm:$0xff]  ;;  %p438_p11 = scmp.lt.s32.totalorder %s252_s8, %s252_s8 }
  0x3a   :  { %329 = vmatpush3.bf16.msra.mxu0 %v328_v4  ;;  %332 = vmatpush3.bf16.msra.mxu1 %v331_v8  ;;  %v337_v14 = vpack.c.bf16 %v150_v13, %v149_v12  ;;  %v152_v16 = vld [vmem:[#allocation7 + $0x38] sm:$0xff]  ;;  %v153_v18 = vld [vmem:[#allocation7 + $0x40] sm:$0xff]  ;;  %v154_v19 = vld [vmem:[#allocation7 + $0x48] sm:$0xff] }
  0x3b   :  { %333 = vmatprep.subr.bf16.mxu1 %v466_v0  ;;  %v340_v17 = vpack.c.bf16 %v152_v16, %v151_v15  ;;  %v343_v20 = vpack.c.bf16 %v154_v19, %v153_v18  ;;  %v155_v21 = vld [vmem:[#allocation7 + $0x50] sm:$0xff]  ;;  %v156_v22 = vld [vmem:[#allocation7 + $0x58] sm:$0xff]  ;;  %v157_v24 = vld [vmem:[#allocation7 + $0x60] sm:$0xff] }
  0x3c   :  { %v346_v23 = vpack.c.bf16 %v156_v22, %v155_v21  ;;  %v158_v25 = vld [vmem:[#allocation7 + $0x68] sm:$0xff]  ;;  %v159_v27 = vld [vmem:[#allocation7 + $0x70] sm:$0xff]  ;;  %v160_v28 = vld [vmem:[#allocation7 + $0x78] sm:$0xff] }
  0x3d   :  { %290 = vmatmul.mubr.msk.f32.vlgmr.msra.gmra.mrb[0].mxu0 %vm70_vm1, %v60_v10  ;;  %v349_v26 = vpack.c.bf16 %v158_v25, %v157_v24  ;;  %v352_v29 = vpack.c.bf16 %v160_v28, %v159_v27  ;;  %v261_v30 = vld [vmem:[%s562_s2] ss:$0 sm:$0xff]  ;;  %s433_s2 = scalar_lea.vmem %s252_s8, 128 }
  0x3e   :  { %335 = vmatpush3.bf16.msra.mxu1 %v334_v11  ;;  %v263_v35 = vld [vmem:[%s564_s4] ss:$0 sm:$0xff]  ;;  %p434_p10 = scmp.ne.s32.totalorder %s252_s8, %s433_s2  ;;  %p439_p12 = scmp.lt.s32.totalorder %s433_s2, %s433_s2 }
  0x3f   :  { %336 = vmatprep.subr.bf16.mxu1 %v466_v0 }
  0x40   :  { %p440_p13 = por %p439_p12, %p438_p11 }
  0x42   :  { %338 = vmatpush3.bf16.msra.mxu1 %v337_v14  ;;  %p441_p0 = pnand %p440_p13, %p434_p10 }
  0x43   :  { %339 = vmatprep.subr.bf16.mxu1 %v466_v0 }
  0x46   :  { %341 = vmatpush3.bf16.msra.mxu1 %v340_v17 }
  0x47   :  { %342 = vmatprep.subr.bf16.mxu1 %v466_v0 }
  0x4a   :  { %344 = vmatpush3.bf16.msra.mxu1 %v343_v20 }
  0x4b   :  { %345 = vmatprep.subr.bf16.mxu1 %v466_v0 }
  0x4e   :  { %347 = vmatpush3.bf16.msra.mxu1 %v346_v23 }
  0x4f   :  { %348 = vmatprep.subr.bf16.mxu1 %v466_v0 }
  0x52   :  { %350 = vmatpush3.bf16.msra.mxu1 %v349_v26 }
  0x53   :  { %351 = vmatprep.subr.bf16.mxu1 %v466_v0 }
  0x56   :  { %353 = vmatpush3.bf16.msra.mxu1 %v352_v29 }
 0x110   :  { %v140_v31 = vpop.f32.mrb[0].mxu0 }
 0x111   :  { %v141_v32 = vadd.f32 %v261_v30, %v140_v31  ;;  %v291_v33 = vpop.f32.mrb[1].mxu0 }
 0x113   :  { %v144_v34 = vmax.f32 %v141_v32, 0.0 }
 0x115   :  { %325 = vmatmul.mubr.f32.vlgmr.msra.gmra.mrb[0].mxu1 %v144_v34 }
 0x1e8   :  { %v234_v36 = vpop.f32.mrb[0].mxu1 }
 0x1e9   :  { %v235_v37 = vadd.f32 %v263_v35, %v234_v36  ;;  %v326_v38 = vpop.f32.mrb[1].mxu1 }
 0x1eb   :  { %v264_v39 = vmul.f32 -1.442695, %v235_v37 }
 0x1ed   :  { %363 = vpow2.f32 %v264_v39 }
 0x1f7   :  { %v364_v40 = vpop.eup %363 }
 0x1f8   :  { %v241_v41 = vadd.f32 1.0, %v364_v40 }
 0x1fa   :  { %365 = vrcp.f32 %v241_v41 }
 0x204   :  { %v366_v42 = vpop.eup %365 }
 0x205   :  { %244 = vst [vmem:[#allocation8] sm:$0xff] %v366_v42 }
 0x206   :  { %444 = shalt.err (!%p441_p0)
}
 0x207   :  { %s445_s10 = scalar_lea.hbm %s565_s5, 128 }
 0x208   :  { %p446_p1 = scmp.ne.s32.totalorder %s565_s5, %s445_s10  ;;  %p449_p2 = scmp.lt.u32.totalorder %s445_s10, %s565_s5 }
 0x20a   :  { %p451_p3 = pnand %p449_p2, %p446_p1 }
 0x20c   :  { %454 = shalt.err (!%p451_p3)
}
 0x20d   :  { %254 = dma.vmem_to_hbm [thread:$0]  %s252_s8, 128, %s565_s5, [#allocation4]  }
 0x20e   :  { %459 = dma.done.wait [#allocation4], 128  }
 0x20f   :  { %460 = vsyncadd [#allocation4], 4294967168 }
 0x210   :  { %258 = vsyncpa [#allocation3], 1 }
 0x211   :  { %259 = vsyncpa [#allocation6], 1 }
 0x212   :  { %260 = vsyncpa [#allocation4], 1 }

</bundles_post_ra>
